<compile_context>
chip_gen: v7x
topology: tpu7x:2x2x1
jax: 0.10.0
libtpu: 0.0.40
codegen_flags: <defaults>
</compile_context>

<pallas_src>
import functools
import math

import jax
import jax.numpy as jnp
from jax.experimental import pallas as pl
from jax.experimental.pallas import tpu as pltpu

ALPHA = 0.9
GAMMA = 2.0
EPSILON = 1e-05


def _fold_lanes(x, ow):
    """Pairwise (tree) fold of a (CG, tm) array down to (CG, ow).

    Uses only 128-aligned lane slices and VPU adds: no XLU cross-lane
    reduction, log-depth dependency chain, pairwise-summation accuracy.
    """
    w = x.shape[1]
    if w == ow:
        return x
    chunks = [x[:, k * ow:(k + 1) * ow] for k in range(w // ow)]
    while len(chunks) > 1:
        nxt = []
        for a in range(0, len(chunks) - 1, 2):
            nxt.append(chunks[a] + chunks[a + 1])
        if len(chunks) % 2:
            nxt.append(chunks[-1])
        chunks = nxt
    return chunks[0]


def _dice_focal_partial_kernel(pred_ref, target_ref,
                               inter_ref, tot_ref, focal_ref,
                               *, alpha, gamma, lane_extent, tm, ow,
                               tiles_per_split, may_mask, binary_target):
    p_split = pl.program_id(1)
    j = pl.program_id(2)

    @pl.when(j == 0)
    def _():
        inter_ref[...] = jnp.zeros_like(inter_ref)
        tot_ref[...] = jnp.zeros_like(tot_ref)
        focal_ref[...] = jnp.zeros_like(focal_ref)

    def accumulate(masked):
        p = pred_ref[...].astype(jnp.float32)    # (CG, tm)
        t = target_ref[...].astype(jnp.float32)  # (CG, tm)

        if masked:
            idx = p_split * tiles_per_split + j
            lane = jax.lax.broadcasted_iota(jnp.int32, p.shape, 1)
            valid = (idx * tm + lane) < lane_extent
            # (p=0, t=0) contributes exactly zero to all three partials
            # (clamped logs keep everything finite), so no extra masking of
            # the partial sums is needed.
            p = jnp.where(valid, p, 0.0)
            t = jnp.where(valid, t, 0.0)

        # Shared statistics: the dice sums double as the focal modulator.
        pt_prod = p * t                       # -> intersection
        pt_sum = p + t                        # -> total
        m = pt_sum - 2.0 * pt_prod            # m = 1 - p_t

        g = float(gamma)
        if g == 2.0:
            modulating = m * m                # avoid pow -> exp/log on the EUP
        elif g == 1.0:
            modulating = m
        elif g == 0.0:
            modulating = jnp.ones_like(m)
        else:
            modulating = m ** g
        alpha_factor = (1.0 - alpha) + t * (2.0 * alpha - 1.0)

        if binary_target:
            # t in {0,1}: BCE == -clamp(log(p_t), -100); one log per element.
            bce = -jnp.maximum(jnp.log(1.0 - m), -100.0)
        else:
            # Exact F.binary_cross_entropy semantics (handles soft targets).
            log_p = jnp.maximum(jnp.log(p), -100.0)
            log_1mp = jnp.maximum(jnp.log(1.0 - p), -100.0)
            bce = -(t * log_p + (1.0 - t) * log_1mp)

        focal_elem = alpha_factor * modulating * bce

        # Lane-dense accumulation into the resident (CG, ow) output blocks.
        inter_ref[...] += _fold_lanes(pt_prod, ow)
        tot_ref[...] += _fold_lanes(pt_sum, ow)
        focal_ref[...] += _fold_lanes(focal_elem, ow)

    if may_mask:
        idx = p_split * tiles_per_split + j
        is_tail = (idx + 1) * tm > lane_extent

        @pl.when(is_tail)
        def _():
            accumulate(True)

        @pl.when(jnp.logical_not(is_tail))
        def _():
            accumulate(False)
    else:
        accumulate(False)


def _choose_group_factor(C, HW):
    """Pick G | HW so the sublane dim C*G fills f32 vregs while the lane
    extent HW/G stays large (prefer mask-free / full-lane tilings)."""
    best_score, best_g = None, 1
    for g in range(1, 65):
        if HW % g:
            continue
        cg = C * g
        if cg > 512:
            break
        l = HW // g
        sub_occ = cg / float(((cg + 7) // 8) * 8)
        lane_occ = min(l, 128) / 128.0
        mask_free = 1 if (l % 128 == 0 or l == HW) else 0
        score = (sub_occ * lane_occ, mask_free, -g)
        if best_score is None or score > best_score:
            best_score, best_g = score, g
    return best_g


def dice_focal_loss(pred, target, *, alpha=ALPHA, gamma=GAMMA,
                    epsilon=EPSILON, reduction='mean',
                    assume_binary_target=False):
    """pred, target: (N, C, H, W); pred holds probabilities in (0, 1).

    assume_binary_target=True enables a single-log BCE fast path that is only
    valid when target is exactly {0, 1}.
    """
    N, C, H, W = pred.shape
    HW = H * W
    numel = N * C * HW

    # Free, contiguous reshape — no HBM transpose pass.
    G = _choose_group_factor(C, HW)
    CG = C * G
    L = HW // G
    pred3 = pred.reshape(N, CG, L)
    target3 = target.reshape(N, CG, L)

    # Lane tile: ~1 MiB of f32 working set per operand block (HBM roofline
    # knee); larger tiles only add VMEM/vreg pressure.  Accounting is done in
    # f32 because the kernel upcasts after DMA regardless of input dtype.
    tm_cap = max(128, min(32768, ((1 << 20) // (CG * 4)) // 128 * 128))
    if L < 128:
        tm, ow, num_j, ragged = L, L, 1, False
    else:
        ow = 128
        base = min(tm_cap, (L // 128) * 128)
        tm = base
        for cand in range(base, max(128, base // 2) - 1, -128):
            if L % cand == 0:
                tm = cand          # mask-free tiling if it costs < 2x tile size
                break
        num_j = -(-L // tm)
        ragged = (L % tm) != 0

    # Second "parallel" axis: balance the two v7x TensorCores when N is odd/1.
    P = 2 if (N % 2 == 1 and num_j >= 2) else 1
    J = -(-num_j // P)
    may_mask = ragged or (P * J > num_j)
    last_j = num_j - 1

    def in_map(n, p, j):
        idx = p * J + j
        if P * J > num_j:
            idx = jnp.minimum(idx, last_j)   # duplicate tile is fully masked out
        return (n, 0, idx)

    in_spec = pl.BlockSpec((None, CG, tm), in_map)
    out_spec = pl.BlockSpec((None, None, CG, ow), lambda n, p, j: (n, p, 0, 0))
    part_shape = jax.ShapeDtypeStruct((N, P, CG, ow), jnp.float32)

    kernel = functools.partial(
        _dice_focal_partial_kernel,
        alpha=float(alpha), gamma=float(gamma),
        lane_extent=L, tm=tm, ow=ow, tiles_per_split=J,
        may_mask=may_mask, binary_target=bool(assume_binary_target))

    inter, tot, focal = pl.pallas_call(
        kernel,
        out_shape=(part_shape, part_shape, part_shape),
        grid_spec=pltpu.PrefetchScalarGridSpec(
            num_scalar_prefetch=0,
            grid=(N, P, J),
            in_specs=[in_spec, in_spec],
            out_specs=(out_spec, out_spec, out_spec),
        ),
        compiler_params=pltpu.CompilerParams(
            dimension_semantics=("parallel", "parallel", "arbitrary"),
            vmem_limit_bytes=32 * 1024 * 1024),
    )(pred3, target3)

    # Tiny finalize on reduced partials: per-class dice + focal sum + mean.
    inter_c = jnp.sum(inter.reshape(N, P, C, G, ow), axis=(0, 1, 3, 4))   # (C,)
    tot_c = jnp.sum(tot.reshape(N, P, C, G, ow), axis=(0, 1, 3, 4))       # (C,)
    dice = 1.0 - (2.0 * inter_c + epsilon) / (tot_c + epsilon)
    total = jnp.sum(focal) + jnp.sum(dice)
    if reduction == 'mean':
        total = total / numel
    return total


def _reference_dice_focal(pred, target, *, alpha=ALPHA, gamma=GAMMA,
                          epsilon=EPSILON):
    # Pure-JAX reference mirroring the PyTorch module (reduction='mean').
    C = pred.shape[1]
    total_loss = 0.0
    for i in range(C):
        p = pred[:, i, :, :].astype(jnp.float32)
        t = target[:, i, :, :].astype(jnp.float32)
        inter = jnp.sum(p * t)
        tot = jnp.sum(p + t)
        dice = 1.0 - (2.0 * inter + epsilon) / (tot + epsilon)
        bce = -(t * jnp.maximum(jnp.log(p), -100.0)
                + (1.0 - t) * jnp.maximum(jnp.log(1.0 - p), -100.0))
        p_t = t * p + (1.0 - t) * (1.0 - p)
        focal = (t * alpha + (1.0 - t) * (1.0 - alpha)) * (1.0 - p_t) ** gamma * bce
        total_loss = total_loss + jnp.sum(focal) + dice
    return total_loss / pred.size


if __name__ == "__main__":
    key = jax.random.PRNGKey(0)
    k1, k2, k3, k4, k5, k6 = jax.random.split(key, 6)

    # Case 1: canonical small shape (single tile, mask-free, P=1).
    N, C, H, W = 2, 4, 16, 16
    pred = jax.nn.sigmoid(jax.random.normal(k1, (N, C, H, W), dtype=jnp.float32))
    target = (jax.random.uniform(k2, (N, C, H, W)) > 0.5).astype(jnp.float32)

    loss = jax.block_until_ready(dice_focal_loss(pred, target))
    ref = _reference_dice_focal(pred, target)
    assert jnp.allclose(loss, ref, rtol=1e-5, atol=1e-6), (loss, ref)

    # Binary-target fast path (single clamped log) — identical for {0,1} masks.
    loss_bin = jax.block_until_ready(
        dice_focal_loss(pred, target, assume_binary_target=True))
    assert jnp.allclose(loss_bin, ref, rtol=1e-5, atol=1e-6), (loss_bin, ref)

    # Case 2: odd N + ragged lane extent -> exercises the gated tail mask and
    # the second parallel grid axis (P=2).
    N2, C2, H2, W2 = 1, 3, 10, 36
    pred2 = jax.nn.sigmoid(jax.random.normal(k3, (N2, C2, H2, W2), dtype=jnp.float32))
    target2 = (jax.random.uniform(k4, (N2, C2, H2, W2)) > 0.5).astype(jnp.float32)
    loss2 = jax.block_until_ready(dice_focal_loss(pred2, target2))
    ref2 = _reference_dice_focal(pred2, target2)
    assert jnp.allclose(loss2, ref2, rtol=1e-5, atol=1e-6), (loss2, ref2)

    # Case 3: wider lane extent -> exercises the lane-dense tree fold.
    N3, C3, H3, W3 = 2, 4, 32, 32
    pred3 = jax.nn.sigmoid(jax.random.normal(k5, (N3, C3, H3, W3), dtype=jnp.float32))
    target3 = (jax.random.uniform(k6, (N3, C3, H3, W3)) > 0.5).astype(jnp.float32)
    loss3 = jax.block_until_ready(dice_focal_loss(pred3, target3))
    ref3 = _reference_dice_focal(pred3, target3)
    assert jnp.allclose(loss3, ref3, rtol=1e-5, atol=1e-6), (loss3, ref3)

    print("KERNEL_OK")
</pallas_src>

<mosaic_0001>
module attributes {stable_mosaic.version = 11 : i64} {
  func.func @_dice_focal_partial_kernel(%arg0: i32, %arg1: i32, %arg2: i32, %arg3: memref<1x8x128xf32, #tpu.memory_space<vmem>>, %arg4: memref<1x8x128xf32, #tpu.memory_space<vmem>>, %arg5: memref<1x1x8x128xf32, #tpu.memory_space<vmem>>, %arg6: memref<1x1x8x128xf32, #tpu.memory_space<vmem>>, %arg7: memref<1x1x8x128xf32, #tpu.memory_space<vmem>>) attributes {dimension_semantics = [#tpu.dimension_semantics<parallel>, #tpu.dimension_semantics<parallel>, #tpu.dimension_semantics<arbitrary>], iteration_bounds = array<i64: 2, 1, 1>, scalar_prefetch = 0 : i64, scratch_operands = 0 : i64, tpu.core_type = #tpu.core_type<tc>, window_params = [{transform_indices = @transform_0, window_bounds = array<i64: 1, 8, 128>}, {transform_indices = @transform_1, window_bounds = array<i64: 1, 8, 128>}, {transform_indices = @transform_2, window_bounds = array<i64: 1, 1, 8, 128>}, {transform_indices = @transform_3, window_bounds = array<i64: 1, 1, 8, 128>}, {transform_indices = @transform_4, window_bounds = array<i64: 1, 1, 8, 128>}]} {
    %c0_i32 = arith.constant 0 : i32
    %0 = arith.cmpi eq, %arg2, %c0_i32 : i32
    %1 = arith.extui %0 : i1 to i32
    %c0_i32_0 = arith.constant 0 : i32
    %2 = arith.cmpi ne, %1, %c0_i32_0 : i32
    scf.if %2 {
      %cst_37 = arith.constant 0.000000e+00 : f32
      %52 = vector.broadcast %cst_37 : f32 to vector<8x128xf32>
      %c0_38 = arith.constant 0 : index
      %c0_39 = arith.constant 0 : index
      %c0_40 = arith.constant 0 : index
      %c0_41 = arith.constant 0 : index
      %53 = vector.load %arg5[%c0_38, %c0_39, %c0_40, %c0_41] : memref<1x1x8x128xf32, #tpu.memory_space<vmem>>, vector<1x1x8x128xf32>
      %54 = vector.shape_cast %53 : vector<1x1x8x128xf32> to vector<8x128xf32>
      %55 = vector.shape_cast %52 : vector<8x128xf32> to vector<1x1x8x128xf32>
      tpu.vector_store %arg5[%c0_38, %c0_39, %c0_40, %c0_41], %55 {strides = array<i32>} : memref<1x1x8x128xf32, #tpu.memory_space<vmem>>, vector<1x1x8x128xf32>,
      %cst_42 = arith.constant 0.000000e+00 : f32
      %56 = vector.broadcast %cst_42 : f32 to vector<8x128xf32>
      %c0_43 = arith.constant 0 : index
      %c0_44 = arith.constant 0 : index
      %c0_45 = arith.constant 0 : index
      %c0_46 = arith.constant 0 : index
      %57 = vector.load %arg6[%c0_43, %c0_44, %c0_45, %c0_46] : memref<1x1x8x128xf32, #tpu.memory_space<vmem>>, vector<1x1x8x128xf32>
      %58 = vector.shape_cast %57 : vector<1x1x8x128xf32> to vector<8x128xf32>
      %59 = vector.shape_cast %56 : vector<8x128xf32> to vector<1x1x8x128xf32>
      tpu.vector_store %arg6[%c0_43, %c0_44, %c0_45, %c0_46], %59 {strides = array<i32>} : memref<1x1x8x128xf32, #tpu.memory_space<vmem>>, vector<1x1x8x128xf32>,
      %cst_47 = arith.constant 0.000000e+00 : f32
      %60 = vector.broadcast %cst_47 : f32 to vector<8x128xf32>
      %c0_48 = arith.constant 0 : index
      %c0_49 = arith.constant 0 : index
      %c0_50 = arith.constant 0 : index
      %c0_51 = arith.constant 0 : index
      %61 = vector.load %arg7[%c0_48, %c0_49, %c0_50, %c0_51] : memref<1x1x8x128xf32, #tpu.memory_space<vmem>>, vector<1x1x8x128xf32>
      %62 = vector.shape_cast %61 : vector<1x1x8x128xf32> to vector<8x128xf32>
      %63 = vector.shape_cast %60 : vector<8x128xf32> to vector<1x1x8x128xf32>
      tpu.vector_store %arg7[%c0_48, %c0_49, %c0_50, %c0_51], %63 {strides = array<i32>} : memref<1x1x8x128xf32, #tpu.memory_space<vmem>>, vector<1x1x8x128xf32>,
    } else {
    }
    %c0 = arith.constant 0 : index
    %c0_1 = arith.constant 0 : index
    %c0_2 = arith.constant 0 : index
    %3 = vector.load %arg3[%c0, %c0_1, %c0_2] : memref<1x8x128xf32, #tpu.memory_space<vmem>>, vector<1x8x128xf32>
    %4 = vector.shape_cast %3 : vector<1x8x128xf32> to vector<8x128xf32>
    %c0_3 = arith.constant 0 : index
    %c0_4 = arith.constant 0 : index
    %c0_5 = arith.constant 0 : index
    %5 = vector.load %arg4[%c0_3, %c0_4, %c0_5] : memref<1x8x128xf32, #tpu.memory_space<vmem>>, vector<1x8x128xf32>
    %6 = vector.shape_cast %5 : vector<1x8x128xf32> to vector<8x128xf32>
    %7 = arith.mulf %4, %6 : vector<8x128xf32>
    %8 = arith.addf %4, %6 : vector<8x128xf32>
    %cst = arith.constant 2.000000e+00 : f32
    %9 = vector.broadcast %cst : f32 to vector<8x128xf32>
    %10 = arith.mulf %9, %7 : vector<8x128xf32>
    %11 = arith.subf %8, %10 : vector<8x128xf32>
    %12 = arith.mulf %11, %11 : vector<8x128xf32>
    %cst_6 = arith.constant 8.000000e-01 : f32
    %13 = vector.broadcast %cst_6 : f32 to vector<8x128xf32>
    %14 = arith.mulf %6, %13 : vector<8x128xf32>
    %cst_7 = arith.constant 1.000000e-01 : f32
    %15 = vector.broadcast %cst_7 : f32 to vector<8x128xf32>
    %16 = arith.addf %15, %14 : vector<8x128xf32>
    %17 = math.log %4 : vector<8x128xf32>
    %cst_8 = arith.constant -1.000000e+02 : f32
    %18 = vector.broadcast %cst_8 : f32 to vector<8x128xf32>
    %19 = arith.maximumf %17, %18 : vector<8x128xf32>
    %cst_9 = arith.constant 1.000000e+00 : f32
    %20 = vector.broadcast %cst_9 : f32 to vector<8x128xf32>
    %21 = arith.subf %20, %4 : vector<8x128xf32>
    %22 = math.log %21 : vector<8x128xf32>
    %cst_10 = arith.constant -1.000000e+02 : f32
    %23 = vector.broadcast %cst_10 : f32 to vector<8x128xf32>
    %24 = arith.maximumf %22, %23 : vector<8x128xf32>
    %25 = arith.mulf %6, %19 : vector<8x128xf32>
    %cst_11 = arith.constant 1.000000e+00 : f32
    %26 = vector.broadcast %cst_11 : f32 to vector<8x128xf32>
    %27 = arith.subf %26, %6 : vector<8x128xf32>
    %28 = arith.mulf %27, %24 : vector<8x128xf32>
    %29 = arith.addf %25, %28 : vector<8x128xf32>
    %cst_12 = arith.constant 0.000000e+00 : f32
    %30 = vector.broadcast %cst_12 : f32 to vector<8x128xf32>
    %31 = arith.subf %30, %29 : vector<8x128xf32>
    %32 = arith.mulf %16, %12 : vector<8x128xf32>
    %33 = arith.mulf %32, %31 : vector<8x128xf32>
    %c0_13 = arith.constant 0 : index
    %c0_14 = arith.constant 0 : index
    %c0_15 = arith.constant 0 : index
    %c0_16 = arith.constant 0 : index
    %34 = vector.load %arg5[%c0_13, %c0_14, %c0_15, %c0_16] : memref<1x1x8x128xf32, #tpu.memory_space<vmem>>, vector<1x1x8x128xf32>
    %35 = vector.shape_cast %34 : vector<1x1x8x128xf32> to vector<8x128xf32>
    %36 = arith.addf %35, %7 : vector<8x128xf32>
    %c0_17 = arith.constant 0 : index
    %c0_18 = arith.constant 0 : index
    %c0_19 = arith.constant 0 : index
    %c0_20 = arith.constant 0 : index
    %37 = vector.load %arg5[%c0_17, %c0_18, %c0_19, %c0_20] : memref<1x1x8x128xf32, #tpu.memory_space<vmem>>, vector<1x1x8x128xf32>
    %38 = vector.shape_cast %37 : vector<1x1x8x128xf32> to vector<8x128xf32>
    %39 = vector.shape_cast %36 : vector<8x128xf32> to vector<1x1x8x128xf32>
    tpu.vector_store %arg5[%c0_17, %c0_18, %c0_19, %c0_20], %39 {strides = array<i32>} : memref<1x1x8x128xf32, #tpu.memory_space<vmem>>, vector<1x1x8x128xf32>,
    %c0_21 = arith.constant 0 : index
    %c0_22 = arith.constant 0 : index
    %c0_23 = arith.constant 0 : index
    %c0_24 = arith.constant 0 : index
    %40 = vector.load %arg6[%c0_21, %c0_22, %c0_23, %c0_24] : memref<1x1x8x128xf32, #tpu.memory_space<vmem>>, vector<1x1x8x128xf32>
    %41 = vector.shape_cast %40 : vector<1x1x8x128xf32> to vector<8x128xf32>
    %42 = arith.addf %41, %8 : vector<8x128xf32>
    %c0_25 = arith.constant 0 : index
    %c0_26 = arith.constant 0 : index
    %c0_27 = arith.constant 0 : index
    %c0_28 = arith.constant 0 : index
    %43 = vector.load %arg6[%c0_25, %c0_26, %c0_27, %c0_28] : memref<1x1x8x128xf32, #tpu.memory_space<vmem>>, vector<1x1x8x128xf32>
    %44 = vector.shape_cast %43 : vector<1x1x8x128xf32> to vector<8x128xf32>
    %45 = vector.shape_cast %42 : vector<8x128xf32> to vector<1x1x8x128xf32>
    tpu.vector_store %arg6[%c0_25, %c0_26, %c0_27, %c0_28], %45 {strides = array<i32>} : memref<1x1x8x128xf32, #tpu.memory_space<vmem>>, vector<1x1x8x128xf32>,
    %c0_29 = arith.constant 0 : index
    %c0_30 = arith.constant 0 : index
    %c0_31 = arith.constant 0 : index
    %c0_32 = arith.constant 0 : index
    %46 = vector.load %arg7[%c0_29, %c0_30, %c0_31, %c0_32] : memref<1x1x8x128xf32, #tpu.memory_space<vmem>>, vector<1x1x8x128xf32>
    %47 = vector.shape_cast %46 : vector<1x1x8x128xf32> to vector<8x128xf32>
    %48 = arith.addf %47, %33 : vector<8x128xf32>
    %c0_33 = arith.constant 0 : index
    %c0_34 = arith.constant 0 : index
    %c0_35 = arith.constant 0 : index
    %c0_36 = arith.constant 0 : index
    %49 = vector.load %arg7[%c0_33, %c0_34, %c0_35, %c0_36] : memref<1x1x8x128xf32, #tpu.memory_space<vmem>>, vector<1x1x8x128xf32>
    %50 = vector.shape_cast %49 : vector<1x1x8x128xf32> to vector<8x128xf32>
    %51 = vector.shape_cast %48 : vector<8x128xf32> to vector<1x1x8x128xf32>
    tpu.vector_store %arg7[%c0_33, %c0_34, %c0_35, %c0_36], %51 {strides = array<i32>} : memref<1x1x8x128xf32, #tpu.memory_space<vmem>>, vector<1x1x8x128xf32>,
    return
  }
  func.func @transform_0(%arg0: i32, %arg1: i32, %arg2: i32) -> (i32, i32, i32) {
    %c1_i32 = arith.constant 1 : i32
    %0 = arith.muli %arg1, %c1_i32 : i32
    %1 = arith.addi %0, %arg2 : i32
    %c0_i32 = arith.constant 0 : i32
    %c0_i32_0 = arith.constant 0 : i32
    return %arg0, %c0_i32, %1 : i32, i32, i32
  }
  func.func @transform_1(%arg0: i32, %arg1: i32, %arg2: i32) -> (i32, i32, i32) {
    %c1_i32 = arith.constant 1 : i32
    %0 = arith.muli %arg1, %c1_i32 : i32
    %1 = arith.addi %0, %arg2 : i32
    %c0_i32 = arith.constant 0 : i32
    %c0_i32_0 = arith.constant 0 : i32
    return %arg0, %c0_i32, %1 : i32, i32, i32
  }
  func.func @transform_2(%arg0: i32, %arg1: i32, %arg2: i32) -> (i32, i32, i32, i32) {
    %c0_i32 = arith.constant 0 : i32
    %c0_i32_0 = arith.constant 0 : i32
    %c0_i32_1 = arith.constant 0 : i32
    return %arg0, %arg1, %c0_i32, %c0_i32_0 : i32, i32, i32, i32
  }
  func.func @transform_3(%arg0: i32, %arg1: i32, %arg2: i32) -> (i32, i32, i32, i32) {
    %c0_i32 = arith.constant 0 : i32
    %c0_i32_0 = arith.constant 0 : i32
    %c0_i32_1 = arith.constant 0 : i32
    return %arg0, %arg1, %c0_i32, %c0_i32_0 : i32, i32, i32, i32
  }
  func.func @transform_4(%arg0: i32, %arg1: i32, %arg2: i32) -> (i32, i32, i32, i32) {
    %c0_i32 = arith.constant 0 : i32
    %c0_i32_0 = arith.constant 0 : i32
    %c0_i32_1 = arith.constant 0 : i32
    return %arg0, %arg1, %c0_i32, %c0_i32_0 : i32, i32, i32, i32
  }
}

</mosaic_0001>

<bundles_post_ra>
// kernel: tpu_custom_call.1
= control target key start
LH: loop header
LB: loop body
LE: loop exit
PB: predicated region body
PF: predicated region fallthrough
CT: control target
= control target key end

     0   :  { %10 = vsyncpa [#allocation3], 0  ;;  %s1222_s0 = inlined_call_operand.hbm [shape: f32[2,8,128], index: 0, kind: input, shape index: {}]   ;;  %s1223_s1 = inlined_call_operand.hbm [shape: f32[2,8,128], index: 1, kind: input, shape index: {}]   ;;  %s1224_s2 = inlined_call_operand.hbm [shape: f32[2,1,8,128], index: 2, kind: output, shape index: {0}]   ;;  %s1225_s3 = inlined_call_operand.hbm [shape: f32[2,1,8,128], index: 3, kind: output, shape index: {1}]   ;;  %s1226_s4 = inlined_call_operand.hbm [shape: f32[2,1,8,128], index: 4, kind: output, shape index: {2}]  }
   0x1   :  { %12 = vsyncpa [#allocation3 + $0x1], 0 }
   0x2   :  { %13 = vsyncpa [#allocation6], 0 }
   0x3   :  { %15 = vsyncpa [#allocation6 + $0x1], 0 }
   0x4   :  { %16 = vsyncpa [#allocation4], 0 }
   0x5   :  { %18 = vsyncpa [#allocation4 + $0x1], 0 }
   0x6   :  { %19 = vsyncpa [#allocation9], 0 }
   0x7   :  { %21 = vsyncpa [#allocation9 + $0x1], 0  ;;  %s913_s15 = smov 0   ;;  %s915_s16 = smov 0  }
   0x8   :  { %s917_s17 = smov 0   ;;  %s919_s18 = smov 0  }
   0x9   :  { %s921_s19 = smov 0   ;;  %s923_s20 = smov 0  }
   0xa LB: > { %s944_s21 = sadd.s32 4294967295, %s881_s20   ;;  %s1227_s22 = sadd.s32 4294967294, %s881_s20   ;;  %s881_s20 = sphi %s923_s20, %s27_s20   ;;  %s877_s19 = sphi %s921_s19, %s1248_s19   ;;  %s873_s18 = sphi %s919_s18, %s1247_s18   ;;  %s869_s17 = sphi %s917_s17, %s1246_s17   ;;  %s865_s16 = sphi %s915_s16, %s1245_s16   ;;  %s861_s15 = sphi %s913_s15, %s1244_s15  }
   0xb   : > { %s46_s23 = sadd.s32 1, %s877_s19  ;;  %s57_s24 = sadd.s32 1, %s869_s17 }
   0xc   : > { %p48_p0 = scmp.ge.s32.totalorder %s46_s23, 2  ;;  %p64_p1 = scmp.ne.s32.totalorder %s869_s17, %s865_s16 }
   0xd   : > { %p65_p2 = scmp.eq.s32.totalorder %s881_s20, 0  ;;  %p70_p3 = scmp.ne.s32.totalorder %s865_s16, %s861_s15 }
   0xe   : > { %s1250_s23 = smov (%p48_p0, %s46_s23), 0  ;;  %p71_p5 = scmp.eq.s32.totalorder %s944_s21, 0 }
   0xf   : > { %p956_p4 = por %p65_p2, %p64_p1  ;;  %s52_s26 = ssub.s32 %s877_s19, %s1250_s23 }
  0x10   : > { %p126_p6 = scmp.eq.s32.totalorder %s944_s21, 1  ;;  %p55_p7 = scmp.eq.s32.totalorder %s52_s26, 0 }
  0x11   : > { %p964_p8 = por %p71_p5, %p70_p3  ;;  %p132_p10 = scmp.eq.s32.totalorder %s1227_s22, 1 }
  0x12   : > { %p968_p9 = por %p126_p6, %p64_p1  ;;  %p620_p13 = scmp.lt.s32.totalorder %s881_s20, 2 }
  0x13   : > { %s1231_s27 = scalar_select %p964_p8, 1, 0 }
  0x14   : > { %s1232_s28 = scalar_select %p968_p9, 1, 0 }
  0x15   : > { %s975_s29 = scalar_select %p55_p7, %s869_s17, %s57_s24  }
  0x16   : > { %p977_p11 = por %p132_p10, %p70_p3  ;;  %s984_s5 = sand.u32 1, %s869_s17  }
  0x17   : > { %s575_s6 = sshll.u32 %s984_s5, 3  ;;  %s576_s7 = sshll.u32 %s877_s19, 7 }
  0x18   : > { %s1233_s30 = scalar_select %p977_p11, 1, 0 }
  0x19   : > { %s993_s10 = scalar_lea.hbm %s1222_s0, %s576_s7  ;;  %s212_s11 = scalar_lea.vmem [#allocation2], %s575_s6 }
  0x1a   : > { %s221_s12 = sshll.u32 %s212_s11, 4  ;;  %p1001_p0 = pnand %p620_p13, %p956_p4  ;;  %s997_s12 = int_to_ptr.vmem [resolvable:$true] %s221_s12 }
  0x1b   : > { %s209_s14 = scalar_lea.sflag [#allocation3], %s984_s5  ;;  %s675_s24 = scalar_lea.hbm %s993_s10, 128 }
  0x1c   : > { %p676_p3 = scmp.ne.s32.totalorder %s993_s10, %s675_s24  ;;  %p677_p5 = pneg %p1001_p0 }
  0x1d   : > { %s680_s25 = scalar_lea.hbm %s1222_s0, 256  ;;  %p681_p4 = scmp.lt.u32.totalorder %s993_s10, %s1222_s0 }
  0x1e   : > { %p678_p6 = pnand %p677_p5, %p676_p3  ;;  %p682_p10 = scmp.lt.u32.totalorder %s680_s25, %s675_s24 }
  0x1f   : > { %p684_p12 = scmp.lt.u32.totalorder %s675_s24, %s993_s10 }
  0x20   : > { %p679_p7 = pneg %p678_p6  ;;  %p683_p13 = por %p682_p10, %p681_p4 }
  0x22   : > { %p685_p1 = por %p684_p12, %p683_p13 }
  0x24   : > { %p686_p2 = pnand %p685_p1, %p679_p7 }
  0x26   : > { %689 = shalt.err (!%p686_p2)
}
  0x27   : > { %s690_s22 = scalar_lea.vmem %s997_s12, 128  ;;  %s883_s26 = smov [#allocation2]  }
  0x28   : > { %p691_p3 = scmp.ne.s32.totalorder %s997_s12, %s690_s22  ;;  %s695_s8 = sshll.u32 %s883_s26, 4  ;;  %s696_s8 = int_to_ptr.vmem [resolvable:$false] %s695_s8 }
  0x29   : > { %s697_s9 = scalar_lea.vmem %s696_s8, 256  ;;  %p698_p9 = scmp.lt.s32.totalorder %s997_s12, %s696_s8 }
  0x2a   : > { %p693_p6 = pnand %p691_p3, %p677_p5  ;;  %p699_p4 = scmp.lt.s32.totalorder %s697_s9, %s690_s22 }
  0x2c   : > { %p694_p11 = pneg %p693_p6  ;;  %p700_p10 = por %p699_p4, %p698_p9 }
  0x2e   : > { %p701_p12 = pnand %p700_p10, %p694_p11 }
  0x30   : > { %704 = shalt.err (!%p701_p12)
}
  0x31   : > { %606 = dma.hbm_to_vmem [thread:$0]  (!%p1001_p0), %s993_s10, 128, %s997_s12, %s209_s14  }
  0x32   : > { %p1235_p1 = scmp.lt.s32.totalorder %s881_s20, 3  ;;  %p1236_p2 = scmp.ge.s32.totalorder %s881_s20, 1 }
  0x33   : > { %s1046_s11 = scalar_lea.hbm %s1223_s1, %s576_s7  ;;  %s232_s26 = scalar_lea.vmem [#allocation5], %s575_s6 }
  0x34   : > { %p1037_p7 = pnand %p1236_p2, %p1235_p1  ;;  %s241_s8 = sshll.u32 %s232_s26, 4  ;;  %s242_s8 = int_to_ptr.vmem [resolvable:$true] %s241_s8 }
  0x35   : > { %s229_s10 = scalar_lea.sflag [#allocation6], %s984_s5  ;;  %s705_s12 = scalar_lea.hbm %s1046_s11, 128 }
  0x36   : > { %s1237_s24 = scalar_select %p1037_p7, 1, 0 }
  0x37   : > { %p706_p9 = scmp.ne.s32.totalorder %s1046_s11, %s705_s12  ;;  %s710_s7 = scalar_lea.hbm %s1223_s1, 256 }
  0x38   : > { %p711_p3 = scmp.lt.u32.totalorder %s1046_s11, %s1223_s1  ;;  %p712_p6 = scmp.lt.u32.totalorder %s710_s7, %s705_s12 }
  0x39   : > { %p708_p11 = pnand %p706_p9, %p677_p5  ;;  %p714_p10 = scmp.lt.u32.totalorder %s705_s12, %s1046_s11 }
  0x3a   : > { %p713_p4 = por %p712_p6, %p711_p3 }
  0x3b   : > { %p709_p13 = pneg %p708_p11 }
  0x3c   : > { %p715_p12 = por %p714_p10, %p713_p4 }
  0x3e   : > { %p716_p1 = pnand %p715_p12, %p709_p13 }
  0x40   : > { %719 = shalt.err (!%p716_p1)
}
  0x41   : > { %s720_s5 = scalar_lea.vmem %s242_s8, 128  ;;  %s884_s6 = smov [#allocation5]  }
  0x42   : > { %p721_p2 = scmp.ne.s32.totalorder %s242_s8, %s720_s5  ;;  %s725_s26 = sshll.u32 %s884_s6, 4  ;;  %s726_s26 = int_to_ptr.vmem [resolvable:$false] %s725_s26 }
  0x43   : > { %s727_s14 = scalar_lea.vmem %s726_s26, 256  ;;  %p728_p8 = scmp.lt.s32.totalorder %s242_s8, %s726_s26 }
  0x44   : > { %p723_p9 = pnand %p721_p2, %p677_p5  ;;  %p729_p7 = scmp.lt.s32.totalorder %s727_s14, %s720_s5 }
  0x46   : > { %p724_p11 = pneg %p723_p9  ;;  %p730_p3 = por %p729_p7, %p728_p8 }
  0x48   : > { %p731_p6 = pnand %p730_p3, %p724_p11 }
  0x4a   : > { %734 = shalt.err (!%p731_p6)
}
  0x4b   : > { %609 = dma.hbm_to_vmem [thread:$0]  (!%p1001_p0), %s1046_s11, 128, %s242_s8, %s229_s10  }
  0x4c   : > { %p1238_p13 = scmp.ne.s32.totalorder %s1237_s24, 0 }
  0x4d   : > { %s1073_s12 = sand.u32 (!%p1238_p13), 1, %s865_s16   ;;  %p1239_p8 = scmp.ne.s32.totalorder (!%p1238_p13), %s1231_s27, 0 }
  0x4e   : > { %250 = sbr.rel (%p1238_p13) target bundleno = 166 (0xa6), region = 28  ;;  %s1076_s9 = sshll.u32 (!%p1238_p13), %s1073_s12, 3 }
  0x4f   : > { %s253_s7 = scalar_lea.sflag (!%p1238_p13), [#allocation3], %s1073_s12  ;;  %s256_s22 = scalar_lea.vmem (!%p1238_p13), [#allocation2], %s1076_s9 }
  0x55   : > { %844 = dma.done.wait (%p1239_p8), %s253_s7, 128  }
  0x56   : > { %846 = vsyncadd (%p1239_p8), %s253_s7, 4294967168  ;;  %s262_s13 = scalar_lea.sflag [#allocation6], %s1073_s12  ;;  %s265_s24 = scalar_lea.vmem [#allocation5], %s1076_s9 }
  0x57   : > { %848 = dma.done.wait (%p1239_p8), %s262_s13, 128  }
  0x58   : > { %850 = vsyncadd (%p1239_p8), %s262_s13, 4294967168  ;;  %s351_s11 = sand.u32 1, %s944_s21   ;;  %s1092_s8 = sshll.u32 %s873_s18, 7  ;;  %v314_v0 = vld [vmem:[%s256_s22] sm:$0xff]  ;;  %v1094_v1 = vld [vmem:[%s265_s24] sm:$0xff] }
  0x59   : > { %s297_s10 = scalar_lea.vmem [#allocation8], %s1076_s9  ;;  %v1098_v2 = vadd.f32 %v1094_v1, %v314_v0  ;;  %671 = vlog2.f32 %v314_v0  ;;  %v326_v3 = vsub.f32 1.0, %v314_v0  ;;  %v1101_v4 = vmul.f32 %v1094_v1, %v314_v0  ;;  %s290_s27 = scalar_lea.vmem [#allocation7], %s1076_s9 }
  0x5a   : > { %s385_s25 = sshll.u32 %s297_s10, 4  ;;  %s371_s21 = sshll.u32 %s290_s27, 4  ;;  %s1110_s25 = int_to_ptr.vmem [resolvable:$true] %s385_s25  ;;  %s1118_s21 = int_to_ptr.vmem [resolvable:$true] %s371_s21 }
  0x5b   : > { %s1108_s6 = scalar_lea.hbm %s1225_s3, %s1092_s8  ;;  %673 = vlog2.f32 %v326_v3  ;;  %s1116_s7 = scalar_lea.hbm %s1224_s2, %s1092_s8  ;;  %342 = vst [vmem:[%s297_s10] sm:$0xff] %v1098_v2  ;;  %339 = vst [vmem:[%s290_s27] sm:$0xff] %v1101_v4 }
  0x5c   : > { %s1122_s22 = scalar_lea.sflag [#allocation9], %s351_s11  ;;  %s735_s13 = scalar_lea.vmem %s1110_s25, 128 }
  0x5d   : > { %p736_p0 = scmp.ne.s32.totalorder %s1110_s25, %s735_s13  ;;  %p1240_p5 = scmp.ne.s32.totalorder %s1232_s28, 0 }
  0x5e   : > { %s885_s24 = smov [#allocation8]  }
  0x5f   : > { %p737_p7 = pnand %p736_p0, %p1240_p5  ;;  %s739_s18 = sshll.u32 %s885_s24, 4  ;;  %s740_s18 = int_to_ptr.vmem [resolvable:$false] %s739_s18 }
  0x60   : > { %s741_s5 = scalar_lea.vmem %s740_s18, 256  ;;  %p742_p10 = scmp.lt.s32.totalorder %s1110_s25, %s740_s18 }
  0x61   : > { %p738_p4 = pneg %p737_p7  ;;  %p743_p12 = scmp.lt.s32.totalorder %s741_s5, %s735_s13 }
  0x63   : > { %p744_p1 = por %p743_p12, %p742_p10 }
  0x65   : > { %p745_p2 = pnand %p744_p1, %p738_p4 }
  0x67   : > { %748 = shalt.err (!%p745_p2)
}
  0x68   : > { %s749_s11 = scalar_lea.hbm %s1108_s6, 128  ;;  %s753_s26 = scalar_lea.hbm %s1225_s3, 256 }
  0x69   : > { %p750_p9 = scmp.ne.s32.totalorder %s1108_s6, %s749_s11  ;;  %p754_p6 = scmp.lt.u32.totalorder %s1108_s6, %s1225_s3 }
  0x6a   : > { %p755_p13 = scmp.lt.u32.totalorder %s753_s26, %s749_s11  ;;  %p757_p0 = scmp.lt.u32.totalorder %s749_s11, %s1108_s6 }
  0x6b   : > { %p751_p11 = pnand %p750_p9, %p1240_p5 }
  0x6c   : > { %p756_p8 = por %p755_p13, %p754_p6 }
  0x6d   : > { %p752_p3 = pneg %p751_p11 }
  0x6e   : > { %p758_p7 = por %p757_p0, %p756_p8 }
  0x70   : > { %p759_p4 = pnand %p758_p7, %p752_p3 }
  0x72   : > { %762 = shalt.err (!%p759_p4)
}
  0x73   : > { %598 = dma.vmem_to_hbm [thread:$0]  (%p1240_p5), %s1110_s25, 128, %s1108_s6, %s1122_s22  }
  0x74   : > { %s347_s13 = scalar_lea.sflag [#allocation4], %s1073_s12  ;;  %s763_s18 = scalar_lea.vmem %s1118_s21, 128 }
  0x75   : > { %p764_p10 = scmp.ne.s32.totalorder %s1118_s21, %s763_s18  ;;  %s886_s5 = smov [#allocation7]  }
  0x76   : > { %s767_s11 = sshll.u32 %s886_s5, 4  ;;  %s768_s11 = int_to_ptr.vmem [resolvable:$false] %s767_s11 }
  0x77   : > { %p765_p12 = pnand %p764_p10, %p1240_p5  ;;  %s769_s10 = scalar_lea.vmem %s768_s11, 256 }
  0x78   : > { %p770_p2 = scmp.lt.s32.totalorder %s1118_s21, %s768_s11  ;;  %p771_p9 = scmp.lt.s32.totalorder %s769_s10, %s763_s18 }
  0x79   : > { %p766_p1 = pneg %p765_p12 }
  0x7a   : > { %p772_p11 = por %p771_p9, %p770_p2 }
  0x7c   : > { %p773_p3 = pnand %p772_p11, %p766_p1 }
  0x7e   : > { %776 = shalt.err (!%p773_p3)
}
  0x7f   : > { %s777_s12 = scalar_lea.hbm %s1116_s7, 128  ;;  %s781_s27 = scalar_lea.hbm %s1224_s2, 256 }
  0x80   : > { %p778_p6 = scmp.ne.s32.totalorder %s1116_s7, %s777_s12  ;;  %p782_p0 = scmp.lt.u32.totalorder %s1116_s7, %s1224_s2 }
  0x81   : > { %p783_p7 = scmp.lt.u32.totalorder %s781_s27, %s777_s12  ;;  %p785_p10 = scmp.lt.u32.totalorder %s777_s12, %s1116_s7 }
  0x82   : > { %p779_p13 = pnand %p778_p6, %p1240_p5 }
  0x83   : > { %p784_p4 = por %p783_p7, %p782_p0 }
  0x84   : > { %p780_p8 = pneg %p779_p13 }
  0x85   : > { %p786_p12 = por %p785_p10, %p784_p4 }
  0x87   : > { %p787_p1 = pnand %p786_p12, %p780_p8 }
  0x89   : > { %790 = shalt.err (!%p787_p1)
}
  0x8a   : > { %597 = dma.vmem_to_hbm [thread:$0]  (%p1240_p5), %s1118_s21, 128, %s1116_s7, %s347_s13   ;;  %v318_v5 = vmul.f32 2.0, %v1101_v4  ;;  %v672_v6 = vpop.eup %671  ;;  %v321_v8 = vmul.f32 0.8, %v1094_v1  ;;  %v331_v13 = vsub.f32 1.0, %v1094_v1 }
  0x8b   : > { %v324_v9 = vmul.f32 0.6931472, %v672_v6  ;;  %v674_v10 = vpop.eup %673  ;;  %s304_s21 = scalar_lea.vmem [#allocation10], %s1076_s9  ;;  %s397_s18 = scalar_lea.hbm %s1226_s4, %s1092_s8 }
  0x8c   : > { %v319_v7 = vsub.f32 %v1098_v2, %v318_v5  ;;  %v328_v12 = vmul.f32 0.6931472, %v674_v10  ;;  %v322_v15 = vadd.f32 0.1, %v321_v8  ;;  %s399_s7 = sshll.u32 %s304_s21, 4  ;;  %s887_s11 = smov [#allocation10]   ;;  %s1174_s7 = int_to_ptr.vmem [resolvable:$true] %s399_s7 }
  0x8d   : > { %v325_v11 = vmax.f32 %v324_v9, -100.0  ;;  %s791_s5 = scalar_lea.vmem %s1174_s7, 128  ;;  %s795_s10 = sshll.u32 %s887_s11, 4  ;;  %s796_s10 = int_to_ptr.vmem [resolvable:$false] %s795_s10 }
  0x8e   : > { %v320_v14 = vmul.f32 %v319_v7, %v319_v7  ;;  %v329_v16 = vmax.f32 %v328_v12, -100.0  ;;  %p792_p2 = scmp.ne.s32.totalorder %s1174_s7, %s791_s5  ;;  %s797_s9 = scalar_lea.vmem %s796_s10, 256 }
  0x8f   : > { %v330_v17 = vmul.f32 %v325_v11, %v1094_v1  ;;  %p798_p3 = scmp.lt.s32.totalorder %s1174_s7, %s796_s10  ;;  %p799_p6 = scmp.lt.s32.totalorder %s797_s9, %s791_s5 }
  0x90   : > { %v332_v18 = vmul.f32 %v331_v13, %v329_v16  ;;  %v335_v20 = vmul.f32 %v322_v15, %v320_v14  ;;  %p793_p9 = pnand %p792_p2, %p1240_p5 }
  0x91   : > { %p800_p13 = por %p799_p6, %p798_p3 }
  0x92   : > { %v333_v19 = vadd.f32 %v332_v18, %v330_v17  ;;  %p794_p11 = pneg %p793_p9 }
  0x94   : > { %v334_v21 = vsub.f32 0.0, %v333_v19  ;;  %p801_p8 = pnand %p800_p13, %p794_p11 }
  0x96   : > { %v336_v22 = vmul.f32 %v335_v20, %v334_v21 }
  0x98   : > { %345 = vst [vmem:[%s304_s21] sm:$0xff] %v336_v22 }
  0x99   : > { %804 = shalt.err (!%p801_p8)
}
  0x9a   : > { %s805_s12 = scalar_lea.hbm %s397_s18, 128  ;;  %s809_s6 = scalar_lea.hbm %s1226_s4, 256 }
  0x9b   : > { %p806_p0 = scmp.ne.s32.totalorder %s397_s18, %s805_s12  ;;  %p810_p10 = scmp.lt.u32.totalorder %s397_s18, %s1226_s4 }
  0x9c   : > { %p811_p12 = scmp.lt.u32.totalorder %s809_s6, %s805_s12  ;;  %p813_p2 = scmp.lt.u32.totalorder %s805_s12, %s397_s18 }
  0x9d   : > { %p807_p7 = pnand %p806_p0, %p1240_p5 }
  0x9e   : > { %p812_p1 = por %p811_p12, %p810_p10 }
  0x9f   : > { %p808_p4 = pneg %p807_p7 }
  0xa0   : > { %p814_p9 = por %p813_p2, %p812_p1 }
  0xa2   : > { %p815_p11 = pnand %p814_p9, %p808_p4 }
  0xa4   : > { %818 = shalt.err (!%p815_p11)
}
  0xa5   : > { %599 = dma.vmem_to_hbm [thread:$0]  (%p1240_p5), %s1174_s7, 128, %s397_s18, %s1122_s22  }
  0xa6 PF: > { %s411_s14 = sand.u32 1, %s861_s15   ;;  %p1241_p3 = scmp.ne.s32.totalorder %s1233_s30, 0 }
  0xa7   : > { %p1242_p6 = scmp.ge.s32.totalorder %s881_s20, 2  ;;  %s412_s21 = scalar_lea.sflag [#allocation4], %s411_s14 }
  0xa9   : > { %p611_p13 = pnand %p1242_p6, %p1241_p3 }
  0xab   : > { %852 = dma.done.wait (!%p611_p13), %s412_s21, 128  }
  0xac   : > { %854 = vsyncadd (!%p611_p13), %s412_s21, 4294967168  ;;  %s1243_s24 = sadd.s32 4294967294, %s881_s20  }
  0xad   : > { %s420_s13 = sand.u32 1, %s1243_s24  }
  0xae   : > { %s421_s5 = scalar_lea.sflag [#allocation9], %s420_s13 }
  0xaf   : > { %856 = dma.done.wait (!%p611_p13), %s421_s5, 256  }
  0xb0   : > { %858 = vsyncadd (!%p611_p13), %s421_s5, 4294967040  ;;  %s27_s20 = sadd.s32 1, %s881_s20   ;;  %s1244_s15 = smov %s865_s16 }
  0xb1   : > { %p24_p5 = scmp.ge.s32.totalorder %s27_s20, 4   ;;  %s1245_s16 = smov %s869_s17 }
  0xb2   : > { %s1246_s17 = smov %s975_s29  ;;  %s1247_s18 = smov %s877_s19 }
  0xb3   : > { %s1248_s19 = smov %s1250_s23  ;;  %26 = sbr.rel (!%p24_p5) target bundleno = 10 (0xa), region = 122 }
  0xba   :  { %435 = vsyncpa [#allocation3], 1 }
  0xbb   :  { %437 = vsyncpa [#allocation3 + $0x1], 1 }
  0xbc   :  { %438 = vsyncpa [#allocation6], 1 }
  0xbd   :  { %440 = vsyncpa [#allocation6 + $0x1], 1 }
  0xbe   :  { %441 = vsyncpa [#allocation4], 1 }
  0xbf   :  { %443 = vsyncpa [#allocation4 + $0x1], 1 }
  0xc0   :  { %444 = vsyncpa [#allocation9], 1 }
  0xc1   :  { %446 = vsyncpa [#allocation9 + $0x1], 1 }

</bundles_post_ra>
